<compile_context>
chip_gen: v5e
topology: v5e:2x2
jax: 0.10.0
libtpu: 0.0.40
codegen_flags: <defaults>
</compile_context>

<pallas_src>
import functools

import jax
import jax.numpy as jnp
from jax.experimental import pallas as pl
from jax.experimental.pallas import tpu as pltpu

_INV_SQRT2 = 0.7071067811865476


def _round_up(x, m):
    return ((x + m - 1) // m) * m


def _mlp_kernel(x_ref, w1_ref, b1_ref, w2_ref, b2_ref, o_ref, acc_ref, *,
                gelu_approximate):
    # grid = (i over row tiles [parallel], k over hidden tiles [reduction]).
    # x_ref:  (tm, C_in)    w1_ref: (C_in, tH)   b1_ref: (1, tH)
    # w2_ref: (tH, C_out)   b2_ref: (1, C_out)   o_ref: (tm, C_out)
    # acc_ref: VMEM (tm, C_out) f32 accumulator.
    k = pl.program_id(1)

    @pl.when(k == 0)
    def _():
        acc_ref[...] = jnp.zeros_like(acc_ref)

    # fc1 partial: native-dtype operands on the MXU, f32 accumulation.
    h = jnp.dot(x_ref[...], w1_ref[...], preferred_element_type=jnp.float32)
    h = h + b1_ref[...].astype(jnp.float32)

    # GELU in f32. Exact erf matches torch.nn.GELU default; the tanh form moves
    # the transcendental to the otherwise-idle EUP slot when parity allows.
    if gelu_approximate:
        h = jax.nn.gelu(h, approximate=True)
    else:
        h = h * 0.5 * (1.0 + jax.lax.erf(h * _INV_SQRT2))

    # dropout(p=0.0) is identity -> no-op.
    # TODO(synk): training-mode dropout with p>0 would need pltpu.prng_* masking.

    # fc2 partial: cast hidden back to the compute dtype so the second matmul
    # also runs at native MXU operand precision; accumulate in f32.
    h = h.astype(x_ref.dtype)
    acc_ref[...] += jnp.dot(h, w2_ref[...], preferred_element_type=jnp.float32)

    @pl.when(k == pl.num_programs(1) - 1)
    def _():
        o_ref[...] = (acc_ref[...]
                      + b2_ref[...].astype(jnp.float32)).astype(o_ref.dtype)


def _vmem_capacity_bytes():
    """Physical VMEM of the attached TPU (128 MiB v5e/v6e, 64 MiB/core v7x)."""
    try:
        info = pltpu.get_tpu_info()
        cap = getattr(info, "vmem_capacity_bytes", None)
        if cap:
            return int(cap)
    except Exception:
        pass
    return 64 * 1024 * 1024  # conservative (v7x-sized) fallback


def _estimate_vmem(tm, tH, C_in, C_out, act_itm, w_itm):
    x_buf = 2 * tm * C_in * act_itm           # double-buffered input row tile
    o_buf = 2 * tm * C_out * act_itm          # double-buffered output tile
    w1_buf = 2 * C_in * tH * w_itm            # double-buffered W1 H-tile
    b1_buf = 2 * tH * w_itm
    w2_buf = 2 * tH * C_out * w_itm           # double-buffered W2 H-tile
    b2_buf = 2 * C_out * w_itm
    acc = tm * C_out * 4                      # f32 accumulator scratch
    hidden = tm * tH * (4 + act_itm)          # f32 hidden tile + dtype-cast copy
    return x_buf + o_buf + w1_buf + b1_buf + w2_buf + b2_buf + acc + hidden


def _choose_tiles(M, C_in, H, C_out, act_itm, w_itm, budget):
    # Row-tile candidates: multiples of 8, biggest first (512 amortizes the
    # per-grid-step overhead and gives tall MXU LHS slabs per weight residency).
    tm_cap = _round_up(min(M, 512), 8)
    tm_cands = [tm_cap] + [t for t in (512, 256, 128, 64, 32, 16, 8) if t < tm_cap]
    # Hidden-tile candidates: prefer no H tiling; otherwise only exact divisors
    # of H that are multiples of 128 (a ragged H tile would corrupt the
    # reduction, unlike a ragged row tile).
    th_cands = [H]
    if H % 128 == 0:
        th_cands += [t for t in (2048, 1024, 512, 256, 128) if t < H and H % t == 0]
    for tm in tm_cands:
        for tH in th_cands:
            if _estimate_vmem(tm, tH, C_in, C_out, act_itm, w_itm) <= budget:
                return tm, tH
    return tm_cands[-1], th_cands[-1]  # best effort (tiny shapes always fit)


def mlp_pallas(x, w1, b1, w2, b2, *, gelu_approximate=False):
    """ViT MLP forward: fc1 -> GELU -> (drop p=0) -> fc2 -> (drop p=0).

    x:  (B, N, C_in)
    w1: (C_in, H),  b1: (H,)      (transposed vs. torch nn.Linear.weight)
    w2: (H, C_out), b2: (C_out,)
    """
    B, N, C_in = x.shape
    H = w1.shape[1]
    C_out = w2.shape[1]
    M = B * N

    act_itm = jnp.dtype(x.dtype).itemsize
    w_itm = jnp.dtype(w1.dtype).itemsize

    vmem_cap = _vmem_capacity_bytes()
    budget = int(vmem_cap * 0.75)             # headroom for compiler temporaries
    tm, tH = _choose_tiles(M, C_in, H, C_out, act_itm, w_itm, budget)

    n_m = pl.cdiv(M, tm)                      # ragged last row tile is fine
    n_h = H // tH                             # tH always divides H exactly

    x2 = x.reshape(M, C_in)                   # no jnp.pad -> no extra HBM copy
    b1_2d = b1.reshape(1, H)
    b2_2d = b2.reshape(1, C_out)

    est = _estimate_vmem(tm, tH, C_in, C_out, act_itm, w_itm)
    # Never clamp the limit below the true footprint; never claim more than ~90%
    # of the physical capacity (so v5e/v6e get ~110 MiB instead of a 64 MiB cap).
    vmem_limit = int(min(vmem_cap * 0.9, max(est * 1.5, 32 * 1024 * 1024)))
    vmem_limit = max(vmem_limit, min(int(est * 1.1), int(vmem_cap * 0.9)))

    cost = pl.CostEstimate(
        flops=2 * M * (C_in * H + H * C_out),
        transcendentals=M * H,
        bytes_accessed=int(M * C_in * act_itm
                           + n_m * (w1.size + b1.size + w2.size + b2.size) * w_itm
                           + M * C_out * act_itm),
    )

    kernel = functools.partial(_mlp_kernel, gelu_approximate=gelu_approximate)

    out2 = pl.pallas_call(
        kernel,
        out_shape=jax.ShapeDtypeStruct((M, C_out), x.dtype),
        grid_spec=pltpu.PrefetchScalarGridSpec(
            num_scalar_prefetch=0,
            grid=(n_m, n_h),
            in_specs=[
                pl.BlockSpec((tm, C_in), lambda i, k: (i, 0)),    # x row tile
                pl.BlockSpec((C_in, tH), lambda i, k: (0, k)),    # W1 H-tile
                pl.BlockSpec((1, tH), lambda i, k: (0, k)),       # b1 H-tile
                pl.BlockSpec((tH, C_out), lambda i, k: (k, 0)),   # W2 H-tile
                pl.BlockSpec((1, C_out), lambda i, k: (0, 0)),    # b2 (invariant)
            ],
            out_specs=pl.BlockSpec((tm, C_out), lambda i, k: (i, 0)),
            scratch_shapes=[pltpu.VMEM((tm, C_out), jnp.float32)],
        ),
        compiler_params=pltpu.CompilerParams(
            dimension_semantics=("parallel", "arbitrary"),
            vmem_limit_bytes=vmem_limit,
        ),
        cost_estimate=cost,
    )(x2, w1, b1_2d, w2, b2_2d)

    return out2.reshape(B, N, C_out)


def mlp_reference(x, w1, b1, w2, b2):
    h = jnp.einsum("bnc,ch->bnh", x.astype(jnp.float32),
                   w1.astype(jnp.float32)) + b1.astype(jnp.float32)
    h = jax.nn.gelu(h, approximate=False)
    y = jnp.einsum("bnh,ho->bno", h, w2.astype(jnp.float32)) + b2.astype(jnp.float32)
    return y


if __name__ == "__main__":
    # Small shapes consistent with the module: batch=2, seq=8,
    # in_features=32, hidden_features=64, out_features=32.
    B, N = 2, 8
    C_in, H, C_out = 32, 64, 32

    key = jax.random.PRNGKey(0)
    kx, kw1, kb1, kw2, kb2 = jax.random.split(key, 5)

    x = jax.random.normal(kx, (B, N, C_in), dtype=jnp.float32)
    # Deterministic synthetic parameters (PyTorch nn.Linear shapes, transposed).
    w1 = jax.random.normal(kw1, (C_in, H), dtype=jnp.float32) * 0.02
    b1 = jax.random.normal(kb1, (H,), dtype=jnp.float32) * 0.02
    w2 = jax.random.normal(kw2, (H, C_out), dtype=jnp.float32) * 0.02
    b2 = jax.random.normal(kb2, (C_out,), dtype=jnp.float32) * 0.02

    ref = mlp_reference(x, w1, b1, w2, b2)

    # f32 path (exact parity with the torch module: exact-erf GELU).
    out = jax.block_until_ready(mlp_pallas(x, w1, b1, w2, b2))
    assert out.shape == (B, N, C_out)
    assert jnp.allclose(out, ref, atol=1e-4, rtol=1e-4), "f32 mismatch vs reference"

    # Ragged-M path (B*N not a multiple of the row tile): exercises the
    # cdiv grid + masked last-block store that replaced the jnp.pad copy.
    x_r = x[:, :7, :]
    out_r = jax.block_until_ready(mlp_pallas(x_r, w1, b1, w2, b2))
    assert out_r.shape == (B, 7, C_out)
    assert jnp.allclose(out_r, ref[:, :7, :], atol=1e-4, rtol=1e-4), \
        "ragged-M mismatch vs reference"

    # bf16 path (MXU-native operands, f32 accumulation) - loose tolerance.
    out_bf = jax.block_until_ready(
        mlp_pallas(x.astype(jnp.bfloat16), w1.astype(jnp.bfloat16),
                   b1.astype(jnp.bfloat16), w2.astype(jnp.bfloat16),
                   b2.astype(jnp.bfloat16)))
    assert out_bf.shape == (B, N, C_out)
    assert jnp.allclose(out_bf.astype(jnp.float32), ref, atol=5e-2, rtol=5e-2), \
        "bf16 mismatch vs reference"

    # tanh-GELU knob (EUP transcendental instead of VALU erf polynomial).
    out_tanh = jax.block_until_ready(
        mlp_pallas(x, w1, b1, w2, b2, gelu_approximate=True))
    assert jnp.allclose(out_tanh, ref, atol=1e-2, rtol=1e-2), \
        "tanh-GELU mismatch vs reference"

    print("KERNEL_OK")
</pallas_src>

<mosaic_0001>
module attributes {stable_mosaic.version = 11 : i64} {
  func.func @_mlp_kernel(%arg0: i32, %arg1: i32, %arg2: memref<16x32xf32, #tpu.memory_space<vmem>>, %arg3: memref<32x64xf32, #tpu.memory_space<vmem>>, %arg4: memref<1x64xf32, #tpu.memory_space<vmem>>, %arg5: memref<64x32xf32, #tpu.memory_space<vmem>>, %arg6: memref<1x32xf32, #tpu.memory_space<vmem>>, %arg7: memref<16x32xf32, #tpu.memory_space<vmem>>, %arg8: memref<16x32xf32, #tpu.memory_space<vmem>>) attributes {dimension_semantics = [#tpu.dimension_semantics<parallel>, #tpu.dimension_semantics<arbitrary>], iteration_bounds = array<i64: 1, 1>, scalar_prefetch = 0 : i64, scratch_operands = 1 : i64, tpu.core_type = #tpu.core_type<tc>, window_params = [{transform_indices = @transform_0, window_bounds = array<i64: 16, 32>}, {transform_indices = @transform_1, window_bounds = array<i64: 32, 64>}, {transform_indices = @transform_2, window_bounds = array<i64: 1, 64>}, {transform_indices = @transform_3, window_bounds = array<i64: 64, 32>}, {pipeline_mode = #tpu.pipeline_mode<synchronous>, transform_indices = @transform_4, window_bounds = array<i64: 1, 32>}, {transform_indices = @transform_5, window_bounds = array<i64: 16, 32>}]} {
    %c0_i32 = arith.constant 0 : i32
    %0 = arith.cmpi eq, %arg1, %c0_i32 : i32
    %1 = arith.extui %0 : i1 to i32
    %c0_i32_0 = arith.constant 0 : i32
    %2 = arith.cmpi ne, %1, %c0_i32_0 : i32
    scf.if %2 {
      %cst_18 = arith.constant 0.000000e+00 : f32
      %25 = vector.broadcast %cst_18 : f32 to vector<16x32xf32>
      %c0_19 = arith.constant 0 : index
      %c0_20 = arith.constant 0 : index
      %26 = vector.load %arg8[%c0_19, %c0_20] : memref<16x32xf32, #tpu.memory_space<vmem>>, vector<16x32xf32>
      tpu.vector_store %arg8[%c0_19, %c0_20], %25 {strides = array<i32>} : memref<16x32xf32, #tpu.memory_space<vmem>>, vector<16x32xf32>,
    } else {
    }
    %c0 = arith.constant 0 : index
    %c0_1 = arith.constant 0 : index
    %3 = vector.load %arg2[%c0, %c0_1] : memref<16x32xf32, #tpu.memory_space<vmem>>, vector<16x32xf32>
    %c0_2 = arith.constant 0 : index
    %c0_3 = arith.constant 0 : index
    %4 = vector.load %arg3[%c0_2, %c0_3] : memref<32x64xf32, #tpu.memory_space<vmem>>, vector<32x64xf32>
    %cst = arith.constant dense<0.000000e+00> : vector<16x64xf32>
    %5 = tpu.matmul %3, %4, %cst {dimension_numbers = #tpu.dot_dimension_numbers<[1], [0], [0], [1], [0, 0, 1, 1], [], []>} : vector<16x32xf32>, vector<32x64xf32>, vector<16x64xf32> -> vector<16x64xf32>
    %c0_4 = arith.constant 0 : index
    %c0_5 = arith.constant 0 : index
    %6 = vector.load %arg4[%c0_4, %c0_5] : memref<1x64xf32, #tpu.memory_space<vmem>>, vector<1x64xf32>
    %7 = vector.broadcast %6 : vector<1x64xf32> to vector<16x64xf32>
    %8 = arith.addf %5, %7 : vector<16x64xf32>
    %cst_6 = arith.constant 5.000000e-01 : f32
    %9 = vector.broadcast %cst_6 : f32 to vector<16x64xf32>
    %10 = arith.mulf %8, %9 : vector<16x64xf32>
    %cst_7 = arith.constant 0.707106769 : f32
    %11 = vector.broadcast %cst_7 : f32 to vector<16x64xf32>
    %12 = arith.mulf %8, %11 : vector<16x64xf32>
    %13 = math.erf %12 : vector<16x64xf32>
    %cst_8 = arith.constant 1.000000e+00 : f32
    %14 = vector.broadcast %cst_8 : f32 to vector<16x64xf32>
    %15 = arith.addf %14, %13 : vector<16x64xf32>
    %16 = arith.mulf %10, %15 : vector<16x64xf32>
    %c0_9 = arith.constant 0 : index
    %c0_10 = arith.constant 0 : index
    %17 = vector.load %arg8[%c0_9, %c0_10] : memref<16x32xf32, #tpu.memory_space<vmem>>, vector<16x32xf32>
    %c0_11 = arith.constant 0 : index
    %c0_12 = arith.constant 0 : index
    %18 = vector.load %arg5[%c0_11, %c0_12] : memref<64x32xf32, #tpu.memory_space<vmem>>, vector<64x32xf32>
    %cst_13 = arith.constant dense<0.000000e+00> : vector<16x32xf32>
    %19 = tpu.matmul %16, %18, %cst_13 {dimension_numbers = #tpu.dot_dimension_numbers<[1], [0], [0], [1], [0, 0, 1, 1], [], []>} : vector<16x64xf32>, vector<64x32xf32>, vector<16x32xf32> -> vector<16x32xf32>
    %20 = arith.addf %17, %19 : vector<16x32xf32>
    %c0_14 = arith.constant 0 : index
    %c0_15 = arith.constant 0 : index
    %21 = vector.load %arg8[%c0_14, %c0_15] : memref<16x32xf32, #tpu.memory_space<vmem>>, vector<16x32xf32>
    tpu.vector_store %arg8[%c0_14, %c0_15], %20 {strides = array<i32>} : memref<16x32xf32, #tpu.memory_space<vmem>>, vector<16x32xf32>,
    %c0_i32_16 = arith.constant 0 : i32
    %22 = arith.cmpi eq, %arg1, %c0_i32_16 : i32
    %23 = arith.extui %22 : i1 to i32
    %c0_i32_17 = arith.constant 0 : i32
    %24 = arith.cmpi ne, %23, %c0_i32_17 : i32
    scf.if %24 {
      %c0_18 = arith.constant 0 : index
      %c0_19 = arith.constant 0 : index
      %25 = vector.load %arg8[%c0_18, %c0_19] : memref<16x32xf32, #tpu.memory_space<vmem>>, vector<16x32xf32>
      %c0_20 = arith.constant 0 : index
      %c0_21 = arith.constant 0 : index
      %26 = vector.load %arg6[%c0_20, %c0_21] : memref<1x32xf32, #tpu.memory_space<vmem>>, vector<1x32xf32>
      %27 = vector.broadcast %26 : vector<1x32xf32> to vector<16x32xf32>
      %28 = arith.addf %25, %27 : vector<16x32xf32>
      %c0_22 = arith.constant 0 : index
      %c0_23 = arith.constant 0 : index
      %29 = vector.load %arg7[%c0_22, %c0_23] : memref<16x32xf32, #tpu.memory_space<vmem>>, vector<16x32xf32>
      tpu.vector_store %arg7[%c0_22, %c0_23], %28 {strides = array<i32>} : memref<16x32xf32, #tpu.memory_space<vmem>>, vector<16x32xf32>,
    } else {
    }
    return
  }
  func.func @transform_0(%arg0: i32, %arg1: i32) -> (i32, i32) {
    %c0_i32 = arith.constant 0 : i32
    %c0_i32_0 = arith.constant 0 : i32
    return %arg0, %c0_i32 : i32, i32
  }
  func.func @transform_1(%arg0: i32, %arg1: i32) -> (i32, i32) {
    %c0_i32 = arith.constant 0 : i32
    %c0_i32_0 = arith.constant 0 : i32
    return %c0_i32, %arg1 : i32, i32
  }
  func.func @transform_2(%arg0: i32, %arg1: i32) -> (i32, i32) {
    %c0_i32 = arith.constant 0 : i32
    %c0_i32_0 = arith.constant 0 : i32
    return %c0_i32, %arg1 : i32, i32
  }
  func.func @transform_3(%arg0: i32, %arg1: i32) -> (i32, i32) {
    %c0_i32 = arith.constant 0 : i32
    %c0_i32_0 = arith.constant 0 : i32
    return %arg1, %c0_i32 : i32, i32
  }
  func.func @transform_4(%arg0: i32, %arg1: i32) -> (i32, i32) {
    %c0_i32 = arith.constant 0 : i32
    %c0_i32_0 = arith.constant 0 : i32
    %c0_i32_1 = arith.constant 0 : i32
    return %c0_i32, %c0_i32_0 : i32, i32
  }
  func.func @transform_5(%arg0: i32, %arg1: i32) -> (i32, i32) {
    %c0_i32 = arith.constant 0 : i32
    %c0_i32_0 = arith.constant 0 : i32
    return %arg0, %c0_i32 : i32, i32
  }
}

</mosaic_0001>

<bundles_post_ra>
// kernel: tpu_custom_call.1
= control target key start
LH: loop header
LB: loop body
LE: loop exit
PB: predicated region body
PF: predicated region fallthrough
CT: control target
= control target key end

     0   :  { %s420_s0 = inlined_call_operand.vmem [shape: f32[16,32], index: 0, kind: input, shape index: {}]   ;;  %s421_s1 = inlined_call_operand.vmem [shape: f32[32,64], index: 1, kind: input, shape index: {}]   ;;  %s422_s2 = inlined_call_operand.vmem [shape: f32[1,64], index: 2, kind: input, shape index: {}]   ;;  %s423_s3 = inlined_call_operand.vmem [shape: f32[64,32], index: 3, kind: input, shape index: {}]   ;;  %s424_s4 = inlined_call_operand.vmem [shape: f32[1,32], index: 4, kind: input, shape index: {}]   ;;  %s425_s5 = inlined_call_operand.hbm [shape: f32[16,32], index: 5, kind: output, shape index: {}]  }
   0x1   :  { %v33_v0 = vld [vmem:[%s421_s1 + $0x18] sm:$0xff]  ;;  %v32_v1 = vld [vmem:[%s421_s1 + $0x10] sm:$0xff]  ;;  %v31_v2 = vld [vmem:[%s421_s1 + $0x8] sm:$0xff] }
   0x2   :  { %57 = vmatpush.msra.mxu0 %v33_v0  ;;  %237 = vmatpush.msra.mxu3 %v33_v0 }
   0x3   :  { %10 = vsyncpa [#allocation4], 0  ;;  %v30_v3 = vld [vmem:[%s421_s1] sm:$0xff]  ;;  %vm25_vm0 = vcmask 261120   ;;  %v29_v5 = vld [vmem:[%s420_s0 + $0x8] sm:$0xff]  ;;  %v285_v56 = vmov 0.0  }
   0x4   :  { %58 = vmatpush.msra.mxu0 %v32_v1  ;;  %238 = vmatpush.msra.mxu3 %v32_v1  ;;  %v28_v4 = vld [vmem:[%s420_s0] sm:$0xff]  ;;  %v165_v14 = vld [vmem:[%s423_s3 + $0x38] sm:$0xff]  ;;  %v164_v18 = vld [vmem:[%s423_s3 + $0x30] sm:$0xff]  ;;  %26 = vst.msk [vmem:[#allocation2] sm:$0xff] %vm25_vm0, %v285_v56  ;;  %vm166_vm9 = vcmask 523264   ;;  %s286_s21 = smov [#allocation3]  }
   0x5   :  { %v253_v6 = vld [vmem:[%s422_s2] ss:$0 sm:$0xff]  ;;  %181 = vmatpush.msra.mxu1 %v165_v14  ;;  %241 = vmatpush.msra.mxu2 %v165_v14  ;;  %v163_v22 = vld [vmem:[%s423_s3 + $0x28] sm:$0xff]  ;;  %v161_v31 = vld [vmem:[%s423_s3 + $0x18] sm:$0xff]  ;;  %27 = vst.msk [vmem:[#allocation2 + $0x8] sm:$0xff] %vm25_vm0, %v285_v56  ;;  %s217_s22 = sshll.u32 %s286_s21, 4  ;;  %s218_s22 = int_to_ptr.vmem [resolvable:$true] %s217_s22 }
   0x6   :  { %59 = vmatpush.msra.mxu0 %v31_v2  ;;  %239 = vmatpush.msra.mxu3 %v31_v2  ;;  %v162_v26 = vld [vmem:[%s423_s3 + $0x20] sm:$0xff]  ;;  %v160_v35 = vld [vmem:[%s423_s3 + $0x10] sm:$0xff]  ;;  %v159_v40 = vld [vmem:[%s423_s3 + $0x8] sm:$0xff]  ;;  %s219_s25 = sshll.u32 %s425_s5, 4  ;;  %s288_s26 = smov 8   ;;  %s220_s25 = int_to_ptr.hbm [resolvable:$true] %s219_s25 }
   0x7   :  { %182 = vmatpush.msra.mxu1 %v164_v18  ;;  %242 = vmatpush.msra.mxu2 %v164_v18  ;;  %v158_v42 = vld [vmem:[%s423_s3] sm:$0xff] }
   0x8   :  { %60 = vmatpush.msra.mxu0 %v30_v3  ;;  %240 = vmatpush.msra.mxu3 %v30_v3 }
   0x9   :  { %231 = vmatmul.msk.f32.vlgmr.msra.gmra.mxu0 %vm25_vm0, %v28_v4  ;;  %232 = vmatmul.msk.f32.vlgmr.msra.gmra.mxu3 %vm25_vm0, %v29_v5 }
   0xa   :  { %183 = vmatpush.msra.mxu1 %v163_v22  ;;  %243 = vmatpush.msra.mxu2 %v163_v22 }
   0xc   :  { %184 = vmatpush.msra.mxu1 %v162_v26  ;;  %244 = vmatpush.msra.mxu2 %v162_v26 }
   0xe   :  { %185 = vmatpush.msra.mxu1 %v161_v31  ;;  %245 = vmatpush.msra.mxu2 %v161_v31 }
  0x10   :  { %186 = vmatpush.msra.mxu1 %v160_v35  ;;  %246 = vmatpush.msra.mxu2 %v160_v35 }
  0x12   :  { %187 = vmatpush.msra.mxu1 %v159_v40  ;;  %247 = vmatpush.msra.mxu2 %v159_v40  ;;  %v157_v40 = vld [vmem:[#allocation2 + $0x8] sm:$0xff] }
  0x14   :  { %188 = vmatpush.msra.mxu1 %v158_v42  ;;  %248 = vmatpush.msra.mxu2 %v158_v42 }
  0x86   :  { %v62_v7 = vpop.f32.mrf.mxu0 }
  0x87   :  { %v342_v8 = vadd.f32 %v253_v6, %v62_v7 }
  0x89   :  { %v345_v9 = vmul.f32 0.70710677, %v342_v8 }
  0x8b   :  { %v72_v10 = vmul.f32 %v345_v9, %v345_v9 }
  0x8c   :  { %v65_v11 = vpop.f32.mrf.mxu3 }
  0x8d   :  { %v349_v12 = vmin.f32 %v72_v10, 16.0  ;;  %v351_v13 = vadd.f32 %v253_v6, %v65_v11 }
  0x8f   :  { %v74_v15 = vmul.f32 2.1237322e-06, %v349_v12  ;;  %v85_v16 = vmul.f32 3.8918573e-05, %v349_v12  ;;  %v359_v17 = vmul.f32 0.70710677, %v351_v13 }
  0x91   :  { %v75_v19 = vadd.f32 0.00028619796, %v74_v15  ;;  %v86_v20 = vadd.f32 0.001143296, %v85_v16  ;;  %v112_v21 = vmul.f32 %v359_v17, %v359_v17 }
  0x93   :  { %v76_v23 = vmul.f32 %v75_v19, %v349_v12  ;;  %v87_v24 = vmul.f32 %v86_v20, %v349_v12  ;;  %v371_v25 = vmin.f32 %v112_v21, 16.0 }
  0x95   :  { %v77_v27 = vadd.f32 0.0036580483, %v76_v23  ;;  %v88_v28 = vadd.f32 0.014752088, %v87_v24  ;;  %v114_v29 = vmul.f32 2.1237322e-06, %v371_v25 }
  0x96   :  { %v125_v30 = vmul.f32 3.8918573e-05, %v371_v25 }
  0x97   :  { %v89_v32 = vmul.f32 %v88_v28, %v349_v12  ;;  %v115_v33 = vadd.f32 0.00028619796, %v114_v29  ;;  %v78_v37 = vmul.f32 %v77_v27, %v349_v12  ;;  %v68_v27 = vmul.f32 0.5, %v342_v8 }
  0x98   :  { %v126_v34 = vadd.f32 0.001143296, %v125_v30 }
  0x99   :  { %v90_v36 = vadd.f32 0.112945676, %v89_v32  ;;  %v116_v38 = vmul.f32 %v115_v33, %v371_v25  ;;  %v79_v46 = vadd.f32 0.05243302, %v78_v37  ;;  %v156_v37 = vld [vmem:[#allocation2] sm:$0xff] }
  0x9a   :  { %v127_v39 = vmul.f32 %v126_v34, %v371_v25  ;;  %v69_v34 = vmul.f32 0.5, %v351_v13 }
  0x9b   :  { %v91_v41 = vmul.f32 %v90_v36, %v349_v12  ;;  %v117_v45 = vadd.f32 0.0036580483, %v116_v38  ;;  %v80_v52 = vmul.f32 %v79_v46, %v349_v12 }
  0x9c   :  { %v128_v43 = vadd.f32 0.014752088, %v127_v39 }
  0x9d   :  { %v92_v44 = vadd.f32 0.4994258, %v91_v41  ;;  %v118_v51 = vmul.f32 %v117_v45, %v371_v25  ;;  %v81_v57 = vadd.f32 0.18741608, %v80_v52 }
  0x9e   :  { %v129_v47 = vmul.f32 %v128_v43, %v371_v25 }
  0x9f   :  { %v93_v48 = vmul.f32 %v92_v44, %v349_v12  ;;  %v119_v55 = vadd.f32 0.05243302, %v118_v51  ;;  %v82_v62 = vmul.f32 %v81_v57, %v349_v12 }
  0xa0   :  { %v130_v49 = vadd.f32 0.112945676, %v129_v47 }
  0xa1   :  { %v94_v50 = vadd.f32 1.0, %v93_v48  ;;  %v120_v61 = vmul.f32 %v119_v55, %v371_v25  ;;  %v83_v3 = vadd.f32 1.1283791, %v82_v62 }
  0xa2   :  { %v131_v53 = vmul.f32 %v130_v49, %v371_v25 }
  0xa3   :  { %255 = vrcp.f32 %v94_v50  ;;  %v106_v1 = vand.u32 2147483648, %v94_v50  ;;  %v121_v2 = vadd.f32 0.18741608, %v120_v61  ;;  %v104_v5 = vand.u32 2147483647, %v94_v50 }
  0xa4   :  { %v132_v54 = vadd.f32 0.4994258, %v131_v53  ;;  %vm100_vm2 = vweird.f32 %v94_v50  ;;  %v84_v15 = vmul.f32 %v83_v3, %v345_v9 }
  0xa5   :  { %v107_v10 = vor.u32 1.1754944e-38, %v106_v1  ;;  %v122_v11 = vmul.f32 %v121_v2, %v371_v25  ;;  %vm105_vm4 = vcmp.eq.f32.partialorder %v104_v5, 8.507059e+37 }
  0xa6   :  { %v133_v58 = vmul.f32 %v132_v54, %v371_v25 }
  0xa7   :  { %v123_v21 = vadd.f32 1.1283791, %v122_v11 }
  0xa8   :  { %v134_v59 = vadd.f32 1.0, %v133_v58 }
  0xa9   :  { %v256_v60 = vpop.eup %255  ;;  %v124_v9 = vmul.f32 %v123_v21, %v359_v17  ;;  %v254_v17 = vld [vmem:[%s424_s4] ss:$0 sm:$0xff]  ;;  %s287_s4 = smov 128  }
  0xaa   :  { %v96_v63 = vmul.f32 %v256_v60, %v94_v50  ;;  %257 = vrcp.f32 %v134_v59  ;;  %vm101_vm1 = vweird.f32 %v256_v60  ;;  %v146_v20 = vand.u32 2147483648, %v134_v59 }
  0xab   :  { %vm102_vm3 = vmor %vm100_vm2, %vm101_vm1  ;;  %v144_v23 = vand.u32 2147483647, %v134_v59  ;;  %vm140_vm6 = vweird.f32 %v134_v59 }
  0xac   :  { %v97_v0 = vsub.f32 1.0, %v96_v63  ;;  %v147_v25 = vor.u32 1.1754944e-38, %v146_v20 }
  0xad   :  { %vm145_vm8 = vcmp.eq.f32.partialorder %v144_v23, 8.507059e+37 }
  0xae   :  { %v98_v4 = vmul.f32 %v256_v60, %v97_v0 }
  0xb0   :  { %v258_v6 = vpop.eup %257  ;;  %v99_v7 = vadd.f32 %v256_v60, %v98_v4 }
  0xb1   :  { %v136_v14 = vmul.f32 %v258_v6, %v134_v59  ;;  %vm141_vm5 = vweird.f32 %v258_v6 }
  0xb2   :  { %v103_v12 = vsel %vm102_vm3, %v256_v60, %v99_v7  ;;  %vm142_vm7 = vmor %vm140_vm6, %vm141_vm5 }
  0xb3   :  { %v108_v16 = vsel %vm105_vm4, %v107_v10, %v103_v12  ;;  %v137_v18 = vsub.f32 1.0, %v136_v14 }
  0xb4   :  { %v109_v19 = vmul.f32 %v108_v16, %v84_v15 }
  0xb5   :  { %v138_v22 = vmul.f32 %v258_v6, %v137_v18 }
  0xb6   :  { %v233_v24 = vclamps-f32 %v109_v19, 1.0 }
  0xb7   :  { %v139_v26 = vadd.f32 %v258_v6, %v138_v22 }
  0xb8   :  { %v152_v28 = vadd.f32 1.0, %v233_v24 }
  0xb9   :  { %v143_v29 = vsel %vm142_vm7, %v258_v6, %v139_v26 }
  0xba   :  { %v148_v30 = vsel %vm145_vm8, %v147_v25, %v143_v29  ;;  %v154_v31 = vmul.f32 %v152_v28, %v68_v27 }
  0xbb   :  { %v149_v32 = vmul.f32 %v148_v30, %v124_v9 }
  0xbc   :  { %235 = vmatmul.msk.f32.vlgmr.msra.gmra.mxu1 %vm166_vm9, %v154_v31 }
  0xbd   :  { %v234_v33 = vclamps-f32 %v149_v32, 1.0 }
  0xbf   :  { %v153_v35 = vadd.f32 1.0, %v234_v33 }
  0xc1   :  { %v155_v36 = vmul.f32 %v153_v35, %v69_v34 }
  0xc3   :  { %236 = vmatmul.msk.f32.vlgmr.msra.gmra.mxu2 %vm166_vm9, %v155_v36 }
 0x139   :  { %v190_v8 = vpop.f32.mrf.mxu1 }
 0x13a   :  { %v196_v38 = vadd.f32 %v190_v8, %v156_v37 }
 0x13c   :  { %198 = vst.msk [vmem:[#allocation2] sm:$0xff] %vm25_vm0, %v196_v38 }
 0x143   :  { %v203_v39 = vld [vmem:[#allocation2] sm:$0xff] }
 0x144   :  { %v209_v41 = vadd.f32 %v254_v17, %v203_v39 }
 0x146   :  { %v193_v42 = vpop.f32.mrf.mxu2  ;;  %211 = vst.msk [vmem:[#allocation3] sm:$0xff] %vm25_vm0, %v209_v41 }
 0x147   :  { %v197_v43 = vadd.f32 %v193_v42, %v157_v40 }
 0x149   :  { %199 = vst.msk [vmem:[#allocation2 + $0x8] sm:$0xff] %vm25_vm0, %v197_v43 }
 0x150   :  { %v204_v13 = vld [vmem:[#allocation2 + $0x8] sm:$0xff] }
 0x151   :  { %v210_v44 = vadd.f32 %v254_v17, %v204_v13 }
 0x153   :  { %212 = vst.msk [vmem:[#allocation3 + $0x8] sm:$0xff] %vm25_vm0, %v210_v44 }
 0x154   :  { %225 = dma.vmem_to_hbm [thread:$0]  %s218_s22, 256, %s220_s25, [#allocation4], %s287_s4, %s287_s4, %s288_s26  }
 0x155   :  { %283 = dma.done.wait [#allocation4], 256  }
 0x156   :  { %284 = vsyncadd [#allocation4], 4294967040 }
 0x157   :  { %230 = vsyncpa [#allocation4], 1 }

</bundles_post_ra>
